<compile_context>
chip_gen: v7x
topology: tpu7x:2x2x1
jax: 0.10.0
libtpu: 0.0.40
codegen_flags: <defaults>
</compile_context>

<pallas_src>
import jax
import jax.numpy as jnp
from jax.experimental import pallas as pl
from jax.experimental.pallas import tpu as pltpu


def _round_up(x: int, m: int) -> int:
    return ((x + m - 1) // m) * m


def make_ncs_kernel(max_action: float):
    def ncs_kernel(x_ref, w1_ref, b1_ref, w2_ref, b2_ref, w3_ref, b3_ref, o_ref):
        # Layer 1: bf16 MXU matmul, f32 accumulation, bias + ReLU in f32.
        x = x_ref[...]                                            # (TB, K_pad) bf16
        h1 = jnp.dot(x, w1_ref[...], preferred_element_type=jnp.float32) + b1_ref[...]
        h1 = jnp.maximum(h1, 0.0)
        # Layer 2
        h2 = jnp.dot(h1.astype(jnp.bfloat16), w2_ref[...],
                     preferred_element_type=jnp.float32) + b2_ref[...]
        h2 = jnp.maximum(h2, 0.0)
        # Layer 3 + sigmoid + scale; output slab is lane-dense (TB, 128*n).
        logits = jnp.dot(h2.astype(jnp.bfloat16), w3_ref[...],
                         preferred_element_type=jnp.float32) + b3_ref[...]
        o_ref[...] = (max_action * jax.nn.sigmoid(logits)).astype(o_ref.dtype)

    return ncs_kernel


def ncs_net_forward(state, params, max_action, tb_max: int = 512):
    """Fused 3-layer MLP forward. Tiles the batch, keeps weights resident in VMEM."""
    w1, b1, w2, b2, w3, b3 = params
    batch, state_dim = state.shape
    hidden = w1.shape[1]
    action_dim = w3.shape[1]

    # Padded dims for clean MXU passes and lane-dense stores.
    k_pad = _round_up(max(state_dim, 128), 128)
    n_pad = _round_up(max(action_dim, 128), 128)

    # Batch tile: big enough to amortize per-step overhead, rounded to the 8-sublane
    # constraint; pad batch to a multiple of TB.
    tb = min(tb_max, _round_up(batch, 8))
    padded_batch = _round_up(batch, tb)
    grid = (padded_batch // tb,)

    # Host-side zero-padding + bf16 cast of matmul operands (halves weight HBM bytes).
    x_p = jnp.zeros((padded_batch, k_pad), jnp.bfloat16)
    x_p = x_p.at[:batch, :state_dim].set(state.astype(jnp.bfloat16))
    w1_p = jnp.zeros((k_pad, hidden), jnp.bfloat16).at[:state_dim, :].set(
        w1.astype(jnp.bfloat16))
    w2_b = w2.astype(jnp.bfloat16)
    w3_p = jnp.zeros((hidden, n_pad), jnp.bfloat16).at[:, :action_dim].set(
        w3.astype(jnp.bfloat16))
    b1_f = b1.astype(jnp.float32)
    b2_f = b2.astype(jnp.float32)
    b3_p = jnp.zeros((1, n_pad), jnp.float32).at[:, :action_dim].set(
        b3.astype(jnp.float32))

    out_padded = pl.pallas_call(
        make_ncs_kernel(float(max_action)),
        out_shape=jax.ShapeDtypeStruct((padded_batch, n_pad), jnp.float32),
        grid=grid,
        in_specs=[
            pl.BlockSpec((tb, k_pad), lambda i: (i, 0)),       # x: tiled over batch
            pl.BlockSpec((k_pad, hidden), lambda i: (0, 0)),   # w1: resident
            pl.BlockSpec((1, hidden), lambda i: (0, 0)),       # b1: resident
            pl.BlockSpec((hidden, hidden), lambda i: (0, 0)),  # w2: resident
            pl.BlockSpec((1, hidden), lambda i: (0, 0)),       # b2: resident
            pl.BlockSpec((hidden, n_pad), lambda i: (0, 0)),   # w3: resident
            pl.BlockSpec((1, n_pad), lambda i: (0, 0)),        # b3: resident
        ],
        out_specs=pl.BlockSpec((tb, n_pad), lambda i: (i, 0)),
        compiler_params=pltpu.CompilerParams(
            dimension_semantics=("parallel",)),  # shards batch tiles across v7x TCs
    )(x_p, w1_p, b1_f, w2_b, b2_f, w3_p, b3_p)

    return out_padded[:batch, :action_dim]


def init_params(key, state_dim, action_dim, hidden=256):
    """Deterministic PyTorch-Linear-style uniform init: U(-1/sqrt(fan_in), 1/sqrt(fan_in))."""
    keys = jax.random.split(key, 6)

    def linear(kw, kb, fan_in, fan_out):
        bound = 1.0 / jnp.sqrt(fan_in)
        w = jax.random.uniform(kw, (fan_in, fan_out), jnp.float32, -bound, bound)
        b = jax.random.uniform(kb, (1, fan_out), jnp.float32, -bound, bound)
        return w, b

    w1, b1 = linear(keys[0], keys[1], state_dim, hidden)
    w2, b2 = linear(keys[2], keys[3], hidden, hidden)
    w3, b3 = linear(keys[4], keys[5], hidden, action_dim)
    return (w1, b1, w2, b2, w3, b3)


def reference_forward(state, params, max_action):
    w1, b1, w2, b2, w3, b3 = params
    a = jnp.maximum(state @ w1 + b1, 0.0)
    a = jnp.maximum(a @ w2 + b2, 0.0)
    return max_action * jax.nn.sigmoid(a @ w3 + b3)


if __name__ == "__main__":
    key = jax.random.PRNGKey(0)
    k_params, k_state = jax.random.split(key)

    batch, state_dim, action_dim = 8, 16, 4
    max_action = 2.0

    params = init_params(k_params, state_dim, action_dim)
    state = jax.random.normal(k_state, (batch, state_dim), jnp.float32)

    out = ncs_net_forward(state, params, max_action)
    out = jax.block_until_ready(out)

    ref = reference_forward(state, params, max_action)
    assert out.shape == (batch, action_dim)
    # bf16 matmul inputs with f32 accumulation -> looser tolerance vs f32 reference.
    assert jnp.allclose(out, ref, atol=3e-2, rtol=3e-2), "mismatch vs reference"

    print("KERNEL_OK")
</pallas_src>

<mosaic_0001>
module attributes {stable_mosaic.version = 11 : i64} {
  func.func @ncs_kernel(%arg0: i32, %arg1: memref<8x128xbf16, #tpu.memory_space<vmem>>, %arg2: memref<128x256xbf16, #tpu.memory_space<vmem>>, %arg3: memref<1x256xf32, #tpu.memory_space<vmem>>, %arg4: memref<256x256xbf16, #tpu.memory_space<vmem>>, %arg5: memref<1x256xf32, #tpu.memory_space<vmem>>, %arg6: memref<256x128xbf16, #tpu.memory_space<vmem>>, %arg7: memref<1x128xf32, #tpu.memory_space<vmem>>, %arg8: memref<8x128xf32, #tpu.memory_space<vmem>>) attributes {dimension_semantics = [#tpu.dimension_semantics<parallel>], iteration_bounds = array<i64: 1>, scalar_prefetch = 0 : i64, scratch_operands = 0 : i64, tpu.core_type = #tpu.core_type<tc>, window_params = [{transform_indices = @transform_0, window_bounds = array<i64: 8, 128>}, {pipeline_mode = #tpu.pipeline_mode<synchronous>, transform_indices = @transform_1, window_bounds = array<i64: 128, 256>}, {pipeline_mode = #tpu.pipeline_mode<synchronous>, transform_indices = @transform_2, window_bounds = array<i64: 1, 256>}, {pipeline_mode = #tpu.pipeline_mode<synchronous>, transform_indices = @transform_3, window_bounds = array<i64: 256, 256>}, {pipeline_mode = #tpu.pipeline_mode<synchronous>, transform_indices = @transform_4, window_bounds = array<i64: 1, 256>}, {pipeline_mode = #tpu.pipeline_mode<synchronous>, transform_indices = @transform_5, window_bounds = array<i64: 256, 128>}, {pipeline_mode = #tpu.pipeline_mode<synchronous>, transform_indices = @transform_6, window_bounds = array<i64: 1, 128>}, {transform_indices = @transform_7, window_bounds = array<i64: 8, 128>}]} {
    %c0 = arith.constant 0 : index
    %c0_0 = arith.constant 0 : index
    %0 = vector.load %arg1[%c0, %c0_0] : memref<8x128xbf16, #tpu.memory_space<vmem>>, vector<8x128xbf16>
    %c0_1 = arith.constant 0 : index
    %c0_2 = arith.constant 0 : index
    %1 = vector.load %arg2[%c0_1, %c0_2] : memref<128x256xbf16, #tpu.memory_space<vmem>>, vector<128x256xbf16>
    %cst = arith.constant dense<0.000000e+00> : vector<8x256xf32>
    %2 = tpu.matmul %0, %1, %cst {dimension_numbers = #tpu.dot_dimension_numbers<[1], [0], [0], [1], [0, 0, 1, 1], [], []>} : vector<8x128xbf16>, vector<128x256xbf16>, vector<8x256xf32> -> vector<8x256xf32>
    %c0_3 = arith.constant 0 : index
    %c0_4 = arith.constant 0 : index
    %3 = vector.load %arg3[%c0_3, %c0_4] : memref<1x256xf32, #tpu.memory_space<vmem>>, vector<1x256xf32>
    %4 = vector.broadcast %3 : vector<1x256xf32> to vector<8x256xf32>
    %5 = arith.addf %2, %4 : vector<8x256xf32>
    %cst_5 = arith.constant 0.000000e+00 : f32
    %6 = vector.broadcast %cst_5 : f32 to vector<8x256xf32>
    %7 = arith.maximumf %5, %6 : vector<8x256xf32>
    %8 = arith.truncf %7 : vector<8x256xf32> to vector<8x256xbf16>
    %c0_6 = arith.constant 0 : index
    %c0_7 = arith.constant 0 : index
    %9 = vector.load %arg4[%c0_6, %c0_7] : memref<256x256xbf16, #tpu.memory_space<vmem>>, vector<256x256xbf16>
    %cst_8 = arith.constant dense<0.000000e+00> : vector<8x256xf32>
    %10 = tpu.matmul %8, %9, %cst_8 {dimension_numbers = #tpu.dot_dimension_numbers<[1], [0], [0], [1], [0, 0, 1, 1], [], []>} : vector<8x256xbf16>, vector<256x256xbf16>, vector<8x256xf32> -> vector<8x256xf32>
    %c0_9 = arith.constant 0 : index
    %c0_10 = arith.constant 0 : index
    %11 = vector.load %arg5[%c0_9, %c0_10] : memref<1x256xf32, #tpu.memory_space<vmem>>, vector<1x256xf32>
    %12 = vector.broadcast %11 : vector<1x256xf32> to vector<8x256xf32>
    %13 = arith.addf %10, %12 : vector<8x256xf32>
    %cst_11 = arith.constant 0.000000e+00 : f32
    %14 = vector.broadcast %cst_11 : f32 to vector<8x256xf32>
    %15 = arith.maximumf %13, %14 : vector<8x256xf32>
    %16 = arith.truncf %15 : vector<8x256xf32> to vector<8x256xbf16>
    %c0_12 = arith.constant 0 : index
    %c0_13 = arith.constant 0 : index
    %17 = vector.load %arg6[%c0_12, %c0_13] : memref<256x128xbf16, #tpu.memory_space<vmem>>, vector<256x128xbf16>
    %cst_14 = arith.constant dense<0.000000e+00> : vector<8x128xf32>
    %18 = tpu.matmul %16, %17, %cst_14 {dimension_numbers = #tpu.dot_dimension_numbers<[1], [0], [0], [1], [0, 0, 1, 1], [], []>} : vector<8x256xbf16>, vector<256x128xbf16>, vector<8x128xf32> -> vector<8x128xf32>
    %c0_15 = arith.constant 0 : index
    %c0_16 = arith.constant 0 : index
    %19 = vector.load %arg7[%c0_15, %c0_16] : memref<1x128xf32, #tpu.memory_space<vmem>>, vector<1x128xf32>
    %20 = vector.broadcast %19 : vector<1x128xf32> to vector<8x128xf32>
    %21 = arith.addf %18, %20 : vector<8x128xf32>
    %22 = arith.negf %21 : vector<8x128xf32>
    %23 = math.exp %22 : vector<8x128xf32>
    %cst_17 = arith.constant 1.000000e+00 : f32
    %24 = vector.broadcast %cst_17 : f32 to vector<8x128xf32>
    %25 = arith.addf %24, %23 : vector<8x128xf32>
    %26 = arith.divf %24, %25 : vector<8x128xf32>
    %cst_18 = arith.constant 2.000000e+00 : f32
    %27 = vector.broadcast %cst_18 : f32 to vector<8x128xf32>
    %28 = arith.mulf %27, %26 : vector<8x128xf32>
    %c0_19 = arith.constant 0 : index
    %c0_20 = arith.constant 0 : index
    %29 = vector.load %arg8[%c0_19, %c0_20] : memref<8x128xf32, #tpu.memory_space<vmem>>, vector<8x128xf32>
    tpu.vector_store %arg8[%c0_19, %c0_20], %28 {strides = array<i32>} : memref<8x128xf32, #tpu.memory_space<vmem>>, vector<8x128xf32>,
    return
  }
  func.func @transform_0(%arg0: i32) -> (i32, i32) {
    %c0_i32 = arith.constant 0 : i32
    %c0_i32_0 = arith.constant 0 : i32
    return %arg0, %c0_i32 : i32, i32
  }
  func.func @transform_1(%arg0: i32) -> (i32, i32) {
    %c0_i32 = arith.constant 0 : i32
    %c0_i32_0 = arith.constant 0 : i32
    %c0_i32_1 = arith.constant 0 : i32
    return %c0_i32, %c0_i32_0 : i32, i32
  }
  func.func @transform_2(%arg0: i32) -> (i32, i32) {
    %c0_i32 = arith.constant 0 : i32
    %c0_i32_0 = arith.constant 0 : i32
    %c0_i32_1 = arith.constant 0 : i32
    return %c0_i32, %c0_i32_0 : i32, i32
  }
  func.func @transform_3(%arg0: i32) -> (i32, i32) {
    %c0_i32 = arith.constant 0 : i32
    %c0_i32_0 = arith.constant 0 : i32
    %c0_i32_1 = arith.constant 0 : i32
    return %c0_i32, %c0_i32_0 : i32, i32
  }
  func.func @transform_4(%arg0: i32) -> (i32, i32) {
    %c0_i32 = arith.constant 0 : i32
    %c0_i32_0 = arith.constant 0 : i32
    %c0_i32_1 = arith.constant 0 : i32
    return %c0_i32, %c0_i32_0 : i32, i32
  }
  func.func @transform_5(%arg0: i32) -> (i32, i32) {
    %c0_i32 = arith.constant 0 : i32
    %c0_i32_0 = arith.constant 0 : i32
    %c0_i32_1 = arith.constant 0 : i32
    return %c0_i32, %c0_i32_0 : i32, i32
  }
  func.func @transform_6(%arg0: i32) -> (i32, i32) {
    %c0_i32 = arith.constant 0 : i32
    %c0_i32_0 = arith.constant 0 : i32
    %c0_i32_1 = arith.constant 0 : i32
    return %c0_i32, %c0_i32_0 : i32, i32
  }
  func.func @transform_7(%arg0: i32) -> (i32, i32) {
    %c0_i32 = arith.constant 0 : i32
    %c0_i32_0 = arith.constant 0 : i32
    return %arg0, %c0_i32 : i32, i32
  }
}

</mosaic_0001>

<bundles_post_ra>
// kernel: tpu_custom_call.1
= control target key start
LH: loop header
LB: loop body
LE: loop exit
PB: predicated region body
PF: predicated region fallthrough
CT: control target
= control target key end

     0   :  { %12 = vsyncpa [#allocation3], 0  ;;  %s1117_s0 = inlined_call_operand.hbm [shape: bf16[8,128], index: 0, kind: input, shape index: {}]   ;;  %s1118_s1 = inlined_call_operand.hbm [shape: bf16[128,256], index: 1, kind: input, shape index: {}]   ;;  %s1119_s2 = inlined_call_operand.vmem [shape: f32[1,256], index: 2, kind: input, shape index: {}]   ;;  %s1120_s3 = inlined_call_operand.hbm [shape: bf16[256,256], index: 3, kind: input, shape index: {}]   ;;  %s1121_s4 = inlined_call_operand.vmem [shape: f32[1,256], index: 4, kind: input, shape index: {}]   ;;  %s1122_s5 = inlined_call_operand.hbm [shape: bf16[256,128], index: 5, kind: input, shape index: {}]   ;;  %s1123_s6 = inlined_call_operand.vmem [shape: f32[1,128], index: 6, kind: input, shape index: {}]   ;;  %s1124_s7 = inlined_call_operand.hbm [shape: f32[8,128], index: 7, kind: output, shape index: {}]  }
   0x1   :  { %13 = vsyncpa [#allocation6], 0 }
   0x2   :  { %14 = vsyncpa [#allocation9], 0 }
   0x3   :  { %15 = vsyncpa [#allocation4], 0  ;;  %s992_s24 = smov [#allocation5]   ;;  %s874_s28 = scalar_lea.hbm %s1118_s1, 2048 }
   0x4   :  { %s31_s25 = sshll.u32 %s992_s24, 4  ;;  %p875_p0 = scmp.ne.s32.totalorder %s1118_s1, %s874_s28  ;;  %s32_s25 = int_to_ptr.vmem [resolvable:$true] %s31_s25 }
   0x5   :  { %p878_p1 = scmp.lt.u32.totalorder %s874_s28, %s1118_s1 }
   0x7   :  { %p880_p2 = pnand %p878_p1, %p875_p0 }
   0x9   :  { %883 = shalt.err (!%p880_p2)
}
   0xa   :  { %s884_s10 = scalar_lea.vmem %s32_s25, 2048  ;;  %p889_p4 = scmp.lt.s32.totalorder %s32_s25, %s32_s25 }
   0xb   :  { %p885_p3 = scmp.ne.s32.totalorder %s32_s25, %s884_s10  ;;  %p890_p5 = scmp.lt.s32.totalorder %s884_s10, %s884_s10 }
   0xd   :  { %p891_p6 = por %p890_p5, %p889_p4 }
   0xf   :  { %p892_p7 = pnand %p891_p6, %p885_p3 }
  0x11   :  { %895 = shalt.err (!%p892_p7)
}
  0x12   :  { %s993_s11 = smov 128   ;;  %s994_s12 = smov 8  }
  0x13   :  { %37 = dma.hbm_to_vmem [thread:$0]  %s1118_s1, 2048, %s32_s25, [#allocation6], %s993_s11, %s993_s11, %s994_s12  }
  0x14   :  { %s995_s15 = smov [#allocation2]   ;;  %s996_s17 = smov [#allocation7]  }
  0x15   :  { %s22_s16 = sshll.u32 %s995_s15, 4  ;;  %s45_s18 = sshll.u32 %s996_s17, 4  ;;  %s23_s16 = int_to_ptr.vmem [resolvable:$true] %s22_s16  ;;  %s46_s18 = int_to_ptr.vmem [resolvable:$true] %s45_s18 }
  0x16   :  { %s896_s21 = scalar_lea.hbm %s1117_s0, 64 }
  0x17   :  { %p897_p8 = scmp.ne.s32.totalorder %s1117_s0, %s896_s21  ;;  %p900_p9 = scmp.lt.u32.totalorder %s896_s21, %s1117_s0 }
  0x19   :  { %p902_p10 = pnand %p900_p9, %p897_p8 }
  0x1b   :  { %905 = shalt.err (!%p902_p10)
}
  0x1c   :  { %s906_s1 = scalar_lea.vmem %s23_s16, 64  ;;  %p911_p12 = scmp.lt.s32.totalorder %s23_s16, %s23_s16 }
  0x1d   :  { %p907_p11 = scmp.ne.s32.totalorder %s23_s16, %s906_s1  ;;  %p912_p13 = scmp.lt.s32.totalorder %s906_s1, %s906_s1 }
  0x1f   :  { %p913_p0 = por %p912_p13, %p911_p12 }
  0x21   :  { %p914_p1 = pnand %p913_p0, %p907_p11 }
  0x23   :  { %917 = shalt.err (!%p914_p1)
}
  0x24   :  { %25 = dma.hbm_to_vmem [thread:$0]  %s1117_s0, 64, %s23_s16, [#allocation3]  }
  0x25   :  { %s918_s30 = scalar_lea.hbm %s1120_s3, 4096 }
  0x26   :  { %p919_p2 = scmp.ne.s32.totalorder %s1120_s3, %s918_s30  ;;  %p922_p3 = scmp.lt.u32.totalorder %s918_s30, %s1120_s3 }
  0x28   :  { %p924_p4 = pnand %p922_p3, %p919_p2 }
  0x2a   :  { %927 = shalt.err (!%p924_p4)
}
  0x2b   :  { %s928_s14 = scalar_lea.vmem %s46_s18, 4096  ;;  %p933_p6 = scmp.lt.s32.totalorder %s46_s18, %s46_s18 }
  0x2c   :  { %p929_p5 = scmp.ne.s32.totalorder %s46_s18, %s928_s14  ;;  %p934_p7 = scmp.lt.s32.totalorder %s928_s14, %s928_s14 }
  0x2e   :  { %p935_p8 = por %p934_p7, %p933_p6 }
  0x30   :  { %p936_p9 = pnand %p935_p8, %p929_p5 }
  0x32   :  { %939 = shalt.err (!%p936_p9)
}
  0x33   :  { %51 = dma.hbm_to_vmem [thread:$0]  %s1120_s3, 4096, %s46_s18, [#allocation6], %s993_s11, %s993_s11, %s994_s12  }
  0x34   :  { %s997_s16 = smov [#allocation8]   ;;  %s940_s21 = scalar_lea.hbm %s1122_s5, 2048 }
  0x35   :  { %s59_s17 = sshll.u32 %s997_s16, 4  ;;  %p941_p10 = scmp.ne.s32.totalorder %s1122_s5, %s940_s21  ;;  %s60_s17 = int_to_ptr.vmem [resolvable:$true] %s59_s17 }
  0x36   :  { %p944_p11 = scmp.lt.u32.totalorder %s940_s21, %s1122_s5 }
  0x38   :  { %p946_p12 = pnand %p944_p11, %p941_p10 }
  0x3a   :  { %949 = shalt.err (!%p946_p12)
}
  0x3b   :  { %s950_s1 = scalar_lea.vmem %s60_s17, 2048  ;;  %p955_p0 = scmp.lt.s32.totalorder %s60_s17, %s60_s17 }
  0x3c   :  { %p951_p13 = scmp.ne.s32.totalorder %s60_s17, %s950_s1  ;;  %p956_p1 = scmp.lt.s32.totalorder %s950_s1, %s950_s1 }
  0x3e   :  { %p957_p2 = por %p956_p1, %p955_p0 }
  0x40   :  { %p958_p3 = pnand %p957_p2, %p951_p13 }
  0x42   :  { %961 = shalt.err (!%p958_p3)
}
  0x43   :  { %s998_s3 = smov 64   ;;  %s999_s11 = smov 4  }
  0x44   :  { %65 = dma.hbm_to_vmem [thread:$0]  %s1122_s5, 2048, %s60_s17, [#allocation9], %s998_s3, %s998_s3, %s999_s11  }
  0x45   :  { %984 = dma.done.wait [#allocation3], 64  }
  0x46   :  { %985 = vsyncadd [#allocation3], 4294967232 }
  0x47   :  { %986 = dma.done.wait [#allocation6], 6144  }
  0x48   :  { %987 = vsyncadd [#allocation6], 4294961152 }
  0x49   :  { %988 = dma.done.wait [#allocation9], 2048  }
  0x4a   :  { %989 = vsyncadd [#allocation9], 4294965248  ;;  %v1000_v0 = vmov 0   ;;  %v782_v1 = vld [vmem:[#allocation5 + $0x4] ss:$8 sps:$4 sm:$0xff]   ;;  %v858_v54 = vld [vmem:[#allocation8 + $0x50] sm:$0xff]   ;;  %v100_v62 = vlaneseq }
  0x4b   :  { %222 = vmatprep.mubr.bf16.mxu0 %v1000_v0  ;;  %v784_v2 = vld [vmem:[#allocation5] ss:$8 sps:$4 sm:$0xff]   ;;  %190 = vmatprep.subr.bf16.mxu0 %v782_v1  ;;  %v785_v3 = vld [vmem:[#allocation5 + $0x14] ss:$8 sps:$4 sm:$0xff]   ;;  %v787_v4 = vld [vmem:[#allocation5 + $0x10] ss:$8 sps:$4 sm:$0xff]  }
  0x4c   :  { %191 = vmatpush1.bf16.msra.mxu0 %v784_v2  ;;  %v788_v5 = vld [vmem:[#allocation5 + $0x24] ss:$8 sps:$4 sm:$0xff]   ;;  %v790_v6 = vld [vmem:[#allocation5 + $0x20] ss:$8 sps:$4 sm:$0xff]   ;;  %v791_v7 = vld [vmem:[#allocation5 + $0x34] ss:$8 sps:$4 sm:$0xff]  }
  0x4d   :  { %192 = vmatprep.subr.bf16.mxu0 %v785_v3  ;;  %v793_v8 = vld [vmem:[#allocation5 + $0x30] ss:$8 sps:$4 sm:$0xff]   ;;  %v794_v9 = vld [vmem:[#allocation5 + $0x44] ss:$8 sps:$4 sm:$0xff]   ;;  %v808_v11 = vld [vmem:[#allocation7] ss:$8 sps:$4 sm:$0xff]  }
  0x4e   :  { %v806_v10 = vld [vmem:[#allocation7 + $0x4] ss:$8 sps:$4 sm:$0xff]   ;;  %v809_v12 = vld [vmem:[#allocation7 + $0x14] ss:$8 sps:$4 sm:$0xff]   ;;  %v796_v13 = vld [vmem:[#allocation5 + $0x40] ss:$8 sps:$4 sm:$0xff]  }
  0x4f   :  { %439 = vmatprep.subr.bf16.mxu1 %v806_v10  ;;  %v811_v14 = vld [vmem:[#allocation7 + $0x10] ss:$8 sps:$4 sm:$0xff]   ;;  %v812_v15 = vld [vmem:[#allocation7 + $0x24] ss:$8 sps:$4 sm:$0xff]   ;;  %v797_v16 = vld [vmem:[#allocation5 + $0x54] ss:$8 sps:$4 sm:$0xff]  }
  0x50   :  { %193 = vmatpush1.bf16.msra.mxu0 %v787_v4  ;;  %440 = vmatpush1.bf16.msra.mxu1 %v808_v11  ;;  %v799_v17 = vld [vmem:[#allocation5 + $0x50] ss:$8 sps:$4 sm:$0xff]   ;;  %v814_v18 = vld [vmem:[#allocation7 + $0x20] ss:$8 sps:$4 sm:$0xff]   ;;  %v815_v19 = vld [vmem:[#allocation7 + $0x34] ss:$8 sps:$4 sm:$0xff]  }
  0x51   :  { %194 = vmatprep.subr.bf16.mxu0 %v788_v5  ;;  %441 = vmatprep.subr.bf16.mxu1 %v809_v12  ;;  %v800_v20 = vld [vmem:[#allocation5 + $0x64] ss:$8 sps:$4 sm:$0xff]   ;;  %v802_v21 = vld [vmem:[#allocation5 + $0x60] ss:$8 sps:$4 sm:$0xff]   ;;  %v817_v22 = vld [vmem:[#allocation7 + $0x30] ss:$8 sps:$4 sm:$0xff]  }
  0x52   :  { %v818_v23 = vld [vmem:[#allocation7 + $0x44] ss:$8 sps:$4 sm:$0xff]   ;;  %v803_v24 = vld [vmem:[#allocation5 + $0x74] ss:$8 sps:$4 sm:$0xff]   ;;  %v805_v25 = vld [vmem:[#allocation5 + $0x70] ss:$8 sps:$4 sm:$0xff]  }
  0x53   :  { %v820_v26 = vld [vmem:[#allocation7 + $0x40] ss:$8 sps:$4 sm:$0xff]   ;;  %v821_v27 = vld [vmem:[#allocation7 + $0x54] ss:$8 sps:$4 sm:$0xff]   ;;  %v823_v29 = vld [vmem:[#allocation7 + $0x50] ss:$8 sps:$4 sm:$0xff]  }
  0x54   :  { %195 = vmatpush1.bf16.msra.mxu0 %v790_v6  ;;  %442 = vmatpush1.bf16.msra.mxu1 %v811_v14  ;;  %v81_v28 = vld [vmem:[#allocation2] sm:$0xf]  ;;  %v824_v30 = vld [vmem:[#allocation7 + $0x64] ss:$8 sps:$4 sm:$0xff]   ;;  %v826_v31 = vld [vmem:[#allocation7 + $0x60] ss:$8 sps:$4 sm:$0xff]  }
  0x55   :  { %196 = vmatprep.subr.bf16.mxu0 %v791_v7  ;;  %443 = vmatprep.subr.bf16.mxu1 %v812_v15  ;;  %v827_v32 = vld [vmem:[#allocation7 + $0x74] ss:$8 sps:$4 sm:$0xff]   ;;  %v829_v33 = vld [vmem:[#allocation7 + $0x70] ss:$8 sps:$4 sm:$0xff]   ;;  %v830_v34 = vld [vmem:[#allocation7 + $0x84] ss:$8 sps:$4 sm:$0xff]  }
  0x56   :  { %v832_v35 = vld [vmem:[#allocation7 + $0x80] ss:$8 sps:$4 sm:$0xff]   ;;  %v833_v36 = vld [vmem:[#allocation7 + $0x94] ss:$8 sps:$4 sm:$0xff]   ;;  %v835_v37 = vld [vmem:[#allocation7 + $0x90] ss:$8 sps:$4 sm:$0xff]  }
  0x57   :  { %v836_v38 = vld [vmem:[#allocation7 + $0xa4] ss:$8 sps:$4 sm:$0xff]   ;;  %v838_v39 = vld [vmem:[#allocation7 + $0xa0] ss:$8 sps:$4 sm:$0xff]   ;;  %v839_v40 = vld [vmem:[#allocation7 + $0xb4] ss:$8 sps:$4 sm:$0xff]  }
  0x58   :  { %197 = vmatpush1.bf16.msra.mxu0 %v793_v8  ;;  %444 = vmatpush1.bf16.msra.mxu1 %v814_v18  ;;  %v841_v41 = vld [vmem:[#allocation7 + $0xb0] ss:$8 sps:$4 sm:$0xff]   ;;  %v842_v42 = vld [vmem:[#allocation7 + $0xc4] ss:$8 sps:$4 sm:$0xff]   ;;  %v844_v43 = vld [vmem:[#allocation7 + $0xc0] ss:$8 sps:$4 sm:$0xff]  }
  0x59   :  { %198 = vmatprep.subr.bf16.mxu0 %v794_v9  ;;  %445 = vmatprep.subr.bf16.mxu1 %v815_v19  ;;  %v845_v44 = vld [vmem:[#allocation7 + $0xd4] ss:$8 sps:$4 sm:$0xff]   ;;  %v847_v45 = vld [vmem:[#allocation7 + $0xd0] ss:$8 sps:$4 sm:$0xff]   ;;  %v848_v46 = vld [vmem:[#allocation7 + $0xe4] ss:$8 sps:$4 sm:$0xff]  }
  0x5a   :  { %v850_v47 = vld [vmem:[#allocation7 + $0xe0] ss:$8 sps:$4 sm:$0xff]   ;;  %v851_v48 = vld [vmem:[#allocation7 + $0xf4] ss:$8 sps:$4 sm:$0xff]   ;;  %v853_v49 = vld [vmem:[#allocation7 + $0xf0] ss:$8 sps:$4 sm:$0xff]  }
  0x5b   :  { %v854_v50 = vld [vmem:[#allocation8 + $0x40] sm:$0xff]   ;;  %v856_v52 = vld [vmem:[#allocation8 + $0x48] sm:$0xff]   ;;  %v859_v55 = vld [vmem:[#allocation8 + $0x10] sm:$0xff]   ;;  %v101_v63 = vshrl.u32 %v100_v62, 7 }
  0x5c   :  { %199 = vmatpush1.bf16.msra.mxu0 %v796_v13  ;;  %446 = vmatpush1.bf16.msra.mxu1 %v817_v22  ;;  %v855_v51 = vld [vmem:[#allocation8] sm:$0xff]   ;;  %v857_v53 = vld [vmem:[#allocation8 + $0x8] sm:$0xff]   ;;  %v860_v56 = vld [vmem:[#allocation8 + $0x58] sm:$0xff]  }
  0x5d   :  { %200 = vmatprep.subr.bf16.mxu0 %v797_v16  ;;  %447 = vmatprep.subr.bf16.mxu1 %v818_v23  ;;  %v861_v57 = vld [vmem:[#allocation8 + $0x18] sm:$0xff]   ;;  %v862_v58 = vld [vmem:[#allocation8 + $0x60] sm:$0xff]   ;;  %v864_v60 = vld [vmem:[#allocation8 + $0x68] sm:$0xff]   ;;  %v102_v0 = vsub.s32 0, %v101_v63  ;;  %v106_v2 = vsub.s32 1, %v101_v63 }
  0x5e   :  { %v863_v59 = vld [vmem:[#allocation8 + $0x20] sm:$0xff]   ;;  %v865_v61 = vld [vmem:[#allocation8 + $0x28] sm:$0xff]   ;;  %v98_v1 = vld [vmem:[%s1119_s2] sm:$0x3] }
  0x5f   :  { %v103_v3 = vrot.slane %v98_v1, %v102_v0  ;;  %v107_v4 = vrot.slane %v98_v1, %v106_v2  ;;  %v866_v15 = vld [vmem:[#allocation8 + $0x70] sm:$0xff]   ;;  %v869_v18 = vld [vmem:[#allocation8 + $0x38] sm:$0xff]  }
  0x60   :  { %201 = vmatpush1.bf16.msra.mxu0 %v799_v17  ;;  %448 = vmatpush1.bf16.msra.mxu1 %v820_v26  ;;  %v867_v16 = vld [vmem:[#allocation8 + $0x30] sm:$0xff]   ;;  %v868_v17 = vld [vmem:[#allocation8 + $0x78] sm:$0xff]  }
  0x61   :  { %202 = vmatprep.subr.bf16.mxu0 %v800_v20  ;;  %449 = vmatprep.subr.bf16.mxu1 %v821_v27  ;;  %v267_v19 = vld [vmem:[%s1121_s4] sm:$0x3]  ;;  %s1001_s4 = smov [#allocation10]  }
  0x62   :  { %v272_v20 = vrot.slane %v267_v19, %v102_v0  ;;  %s673_s30 = sshll.u32 %s1001_s4, 4  ;;  %s674_s30 = int_to_ptr.vmem [resolvable:$true] %s673_s30 }
  0x63   :  { %s962_s8 = scalar_lea.vmem %s674_s30, 128  ;;  %p967_p5 = scmp.lt.s32.totalorder %s674_s30, %s674_s30 }
  0x64   :  { %203 = vmatpush1.bf16.msra.mxu0 %v802_v21  ;;  %450 = vmatpush1.bf16.msra.mxu1 %v823_v29  ;;  %v276_v21 = vrot.slane %v267_v19, %v106_v2  ;;  %p963_p4 = scmp.ne.s32.totalorder %s674_s30, %s962_s8  ;;  %p968_p6 = scmp.lt.s32.totalorder %s962_s8, %s962_s8 }
  0x65   :  { %204 = vmatprep.subr.bf16.mxu0 %v803_v24  ;;  %451 = vmatprep.subr.bf16.mxu1 %v824_v30 }
  0x66   :  { %p969_p7 = por %p968_p6, %p967_p5 }
  0x68   :  { %205 = vmatpush1.bf16.msra.mxu0 %v805_v25  ;;  %452 = vmatpush1.bf16.msra.mxu1 %v826_v31  ;;  %p970_p8 = pnand %p969_p7, %p963_p4 }
  0x69   :  { %453 = vmatprep.subr.bf16.mxu1 %v827_v32  ;;  %750 = vmatprep.subr.bf16.mxu0 %v854_v50 }
  0x6b   :  { %223 = vmatmul.mubr.bf16.vlgmr.msra.gmra.mrb[0].mxu0 %v81_v28 }
  0x6c   :  { %454 = vmatpush1.bf16.msra.mxu1 %v829_v33  ;;  %751 = vmatpush3.bf16.msra.mxu0 %v855_v51  ;;  %v732_v33 = vld [vmem:[%s1123_s6] ss:$0 sm:$0xff] }
  0x6d   :  { %455 = vmatprep.subr.bf16.mxu1 %v830_v34  ;;  %752 = vmatprep.subr.bf16.mxu0 %v856_v52 }
  0x70   :  { %456 = vmatpush1.bf16.msra.mxu1 %v832_v35  ;;  %753 = vmatpush3.bf16.msra.mxu0 %v857_v53 }
  0x71   :  { %457 = vmatprep.subr.bf16.mxu1 %v833_v36  ;;  %754 = vmatprep.subr.bf16.mxu0 %v858_v54 }
  0x74   :  { %458 = vmatpush1.bf16.msra.mxu1 %v835_v37  ;;  %755 = vmatpush3.bf16.msra.mxu0 %v859_v55 }
  0x75   :  { %459 = vmatprep.subr.bf16.mxu1 %v836_v38  ;;  %756 = vmatprep.subr.bf16.mxu0 %v860_v56 }
  0x78   :  { %460 = vmatpush1.bf16.msra.mxu1 %v838_v39  ;;  %757 = vmatpush3.bf16.msra.mxu0 %v861_v57 }
  0x79   :  { %461 = vmatprep.subr.bf16.mxu1 %v839_v40  ;;  %758 = vmatprep.subr.bf16.mxu0 %v862_v58 }
  0x7c   :  { %462 = vmatpush1.bf16.msra.mxu1 %v841_v41  ;;  %759 = vmatpush3.bf16.msra.mxu0 %v863_v59 }
  0x7d   :  { %463 = vmatprep.subr.bf16.mxu1 %v842_v42  ;;  %760 = vmatprep.subr.bf16.mxu0 %v864_v60 }
  0x80   :  { %464 = vmatpush1.bf16.msra.mxu1 %v844_v43  ;;  %761 = vmatpush3.bf16.msra.mxu0 %v865_v61 }
  0x81   :  { %465 = vmatprep.subr.bf16.mxu1 %v845_v44  ;;  %762 = vmatprep.subr.bf16.mxu0 %v866_v15 }
  0x84   :  { %466 = vmatpush1.bf16.msra.mxu1 %v847_v45  ;;  %763 = vmatpush3.bf16.msra.mxu0 %v867_v16 }
  0x85   :  { %467 = vmatprep.subr.bf16.mxu1 %v848_v46  ;;  %764 = vmatprep.subr.bf16.mxu0 %v868_v17 }
  0x88   :  { %468 = vmatpush1.bf16.msra.mxu1 %v850_v47  ;;  %765 = vmatpush3.bf16.msra.mxu0 %v869_v18 }
  0x89   :  { %469 = vmatprep.subr.bf16.mxu1 %v851_v48 }
  0x8c   :  { %470 = vmatpush1.bf16.msra.mxu1 %v853_v49 }
 0x13e   :  { %v224_v5 = vpop.f32.mrb[0].mxu0 }
 0x13f   :  { %v225_v6 = vadd.f32 %v224_v5, %v103_v3  ;;  %v226_v7 = vpop.f32.mrb[1].mxu0 }
 0x140   :  { %v227_v8 = vadd.f32 %v226_v7, %v107_v4  ;;  %v228_v9 = vpop.f32.mrb[2].mxu0 }
 0x141   :  { %v231_v10 = vmax.f32 %v225_v6, 0.0  ;;  %v229_v11 = vpop.f32.mrb[3].mxu0 }
 0x142   :  { %v232_v12 = vmax.f32 %v227_v8, 0.0 }
 0x143   :  { %v233_v14 = vpack.c.bf16 %v231_v10, %v231_v10 }
 0x144   :  { %v234_v13 = vpack.c.bf16 %v232_v12, %v232_v12 }
 0x146   :  { %471 = vmatprep.mubr.bf16.mxu1 %v234_v13 }
 0x147   :  { %472 = vmatmul.mubr.bf16.vlgmr.msra.gmra.mrb[0].mxu1 %v233_v14 }
 0x21a   :  { %v473_v22 = vpop.f32.mrb[0].mxu1 }
 0x21b   :  { %v474_v23 = vadd.f32 %v473_v22, %v272_v20  ;;  %v475_v24 = vpop.f32.mrb[1].mxu1 }
 0x21c   :  { %v476_v25 = vadd.f32 %v475_v24, %v276_v21  ;;  %v477_v26 = vpop.f32.mrb[2].mxu1 }
 0x21d   :  { %v480_v27 = vmax.f32 %v474_v23, 0.0  ;;  %v478_v28 = vpop.f32.mrb[3].mxu1 }
 0x21e   :  { %v481_v29 = vmax.f32 %v476_v25, 0.0 }
 0x21f   :  { %v482_v31 = vpack.c.bf16 %v480_v27, %v480_v27 }
 0x220   :  { %v483_v30 = vpack.c.bf16 %v481_v29, %v481_v29 }
 0x222   :  { %651 = vmatprep.mubr.bf16.mxu0 %v483_v30 }
 0x223   :  { %652 = vmatmul.mubr.bf16.vlgmr.msra.gmra.mrb[4].mxu0 %v482_v31 }
 0x2f6   :  { %v766_v32 = vpop.f32.mrb[4].mxu0 }
 0x2f7   :  { %v767_v34 = vpop.f32.mrb[5].mxu0 }
 0x2f8   :  { %v768_v35 = vadd.f32 %v767_v34, %v766_v32  ;;  %v769_v36 = vpop.f32.mrb[6].mxu0 }
 0x2f9   :  { %v770_v37 = vpop.f32.mrb[7].mxu0 }
 0x2fa   :  { %v654_v38 = vadd.f32 %v768_v35, %v732_v33 }
 0x2fc   :  { %v749_v39 = vmul.f32 -1.442695, %v654_v38 }
 0x2fe   :  { %870 = vpow2.f32 %v749_v39 }
 0x308   :  { %v871_v40 = vpop.eup %870 }
 0x309   :  { %v662_v41 = vadd.f32 1.0, %v871_v40 }
 0x30b   :  { %872 = vrcp.f32 %v662_v41 }
 0x315   :  { %v873_v42 = vpop.eup %872 }
 0x316   :  { %v665_v43 = vmul.f32 2.0, %v873_v42 }
 0x318   :  { %666 = vst [vmem:[#allocation10] sm:$0xff] %v665_v43 }
 0x319   :  { %973 = shalt.err (!%p970_p8)
}
 0x31a   :  { %s974_s10 = scalar_lea.hbm %s1124_s7, 128 }
 0x31b   :  { %p975_p9 = scmp.ne.s32.totalorder %s1124_s7, %s974_s10  ;;  %p978_p10 = scmp.lt.u32.totalorder %s974_s10, %s1124_s7 }
 0x31d   :  { %p980_p11 = pnand %p978_p10, %p975_p9 }
 0x31f   :  { %983 = shalt.err (!%p980_p11)
}
 0x320   :  { %676 = dma.vmem_to_hbm [thread:$0]  %s674_s30, 128, %s1124_s7, [#allocation4]  }
 0x321   :  { %990 = dma.done.wait [#allocation4], 128  }
 0x322   :  { %991 = vsyncadd [#allocation4], 4294967168 }
 0x323   :  { %680 = vsyncpa [#allocation3], 1 }
 0x324   :  { %681 = vsyncpa [#allocation6], 1 }
 0x325   :  { %682 = vsyncpa [#allocation9], 1 }
 0x326   :  { %683 = vsyncpa [#allocation4], 1 }

</bundles_post_ra>
